<compile_context>
chip_gen: v5e
topology: v5e:2x2
jax: 0.10.0
libtpu: 0.0.40
codegen_flags: <defaults>
</compile_context>

<pallas_src>
import jax
import jax.numpy as jnp
from jax import lax
from jax.experimental import pallas as pl
from jax.experimental.pallas import tpu as pltpu

EPS = 1e-5


def _round_up(x, m):
    return (x + m - 1) // m * m


def _vmem_budget_bytes():
    """Generation-aware scoped-VMEM budget: ~75% of physical VMEM, clamped.

    v5e/v6e (128 MiB physical) -> 96 MiB; v7x (64 MiB per TensorCore) -> 48 MiB.
    """
    try:
        phys = int(pltpu.get_tpu_info().vmem_capacity_bytes)
    except Exception:
        phys = 64 * 1024 * 1024  # conservative (v7x-sized) fallback
    return max(32 * 1024 * 1024, min(phys * 3 // 4, 96 * 1024 * 1024))


def _derive_tiling(L, K, E_pad, out_bytes, vmem_budget):
    """Pick rows-per-grid-step tn and padded per-batch length Lp.

    Pass-2 per-step VMEM (the heavier pass):
      2 x bf16 patch tile (double buffer)          : 2 * tn * K * 2
      2 x output tile (double buffer)              : 2 * tn * E_pad * out_bytes
      ~3 f32 (E_pad, tn) temps (matmul, affine...) : 3 * tn * E_pad * 4
      2 x bf16 weights (double buffer, tiny)       : 2 * K * E_pad * 2
    """
    tile_budget = int(vmem_budget * 0.7)          # headroom for Mosaic scratch
    weight_bytes = 4 * K * E_pad
    per_row = 4 * K + (2 * out_bytes + 12) * E_pad
    cap = (tile_budget - weight_bytes) // per_row
    cap = max(128, min(8192, (cap // 128) * 128))
    if L <= cap:
        tn = _round_up(L, 16)     # bf16 sublane packing = 16 rows / vreg
        return tn, tn             # single tile per batch; block == full dims
    return cap, _round_up(L, cap)


def _stats_kernel(patch_ref, w_ref, sum_ref, sq_ref):
    """Per-batch conv-output sum / sum-of-squares, accumulated over the L axis."""
    @pl.when(pl.program_id(1) == 0)
    def _():
        sum_ref[...] = jnp.zeros_like(sum_ref)
        sq_ref[...] = jnp.zeros_like(sq_ref)

    # (tn, K) @ (K, E_pad) -> (tn, E_pad) f32 on the MXU.
    y = jnp.dot(patch_ref[...], w_ref[...], preferred_element_type=jnp.float32)
    # [8, E_pad] sublane-aligned partial: pure VALU adds, no per-tile XLU
    # cross-sublane collapse.  Final 8 -> 1 reduction happens in the wrapper.
    y3 = y.reshape(y.shape[0] // 8, 8, y.shape[1])
    sum_ref[...] += jnp.sum(y3, axis=0)
    sq_ref[...] += jnp.sum(y3 * y3, axis=0)


def _normalize_kernel(patch_ref, w_ref, scale_ref, shift_ref, out_ref):
    """Recompute the patch matmul in (E, n) orientation and apply the folded BN
    affine; single lane-dense bf16 store directly in channels-first layout."""
    # yT[e, n] = sum_k w[e, k] * patch[n, k]  (q.k^T-style contraction), so the
    # output is born [E_pad, tn] and no transpose (in-kernel or XLA) is needed.
    yT = lax.dot_general(
        w_ref[...], patch_ref[...],
        dimension_numbers=(((1,), (1,)), ((), ())),
        preferred_element_type=jnp.float32)
    out_ref[...] = (yT * scale_ref[...] + shift_ref[...]).astype(out_ref.dtype)


def embedding_forward(x, weight, bias, gamma, beta, *, patch_size=3, stride=3,
                      out_dtype=jnp.bfloat16, compute_dtype=jnp.bfloat16):
    """Conv3d(k=stride, pad=0) + training-mode BatchNorm3d.

    x: [B, C, D, H, W] -> [B, E, D//k, H//k, W//k] in `out_dtype` (default bf16
    to halve the output-side HBM traffic; pass jnp.float32 for an f32 output).
    """
    del bias  # cancelled exactly by the training-mode BN mean subtraction
    B, C, D, H, W = x.shape
    E = weight.shape[0]
    k = patch_size
    assert stride == k, "patch-embedding fast path assumes stride == kernel_size"
    Do, Ho, Wo = D // k, H // k, W // k
    L = Do * Ho * Wo
    K = C * k * k * k
    E_pad = _round_up(E, 128)  # lane-dense stores/accumulators even for E=96/192/...

    # im2col (glue, plain JAX) in bf16 to halve the gather's HBM traffic.
    # TODO(synk): fuse the NCDHW -> patch-row rearrangement into the kernel
    # (slab BlockSpecs over the raw input) to remove this extra HBM round trip.
    xp = x[:, :, : Do * k, : Ho * k, : Wo * k].astype(compute_dtype)
    xp = xp.reshape(B, C, Do, k, Ho, k, Wo, k)
    xp = xp.transpose(0, 2, 4, 6, 1, 3, 5, 7)              # [B, D',H',W', C,k,k,k]
    patches = xp.reshape(B, L, K)                          # [B, L, K]

    # Weights, zero-padded along E to E_pad (padded channels sliced off later).
    w_ek = weight.reshape(E, K).astype(compute_dtype)      # [E, K]
    if E_pad != E:
        w_ek = jnp.pad(w_ek, ((0, E_pad - E), (0, 0)))
    w_ke = w_ek.T                                          # [K, E_pad] (tiny)

    out_bytes = jnp.dtype(out_dtype).itemsize
    vmem_budget = _vmem_budget_bytes()
    tn, Lp = _derive_tiling(L, K, E_pad, out_bytes, vmem_budget)
    if Lp != L:
        # Padded rows are all-zero; with the conv bias dropped they contribute
        # exactly zero to both sum and sum-of-squares -> no masking needed.
        patches = jnp.pad(patches, ((0, 0), (0, Lp - L), (0, 0)))
    n_l = Lp // tn

    # ---- pass 1: batch statistics ------------------------------------------
    # Per-batch [8, E_pad] partials; B is "parallel" (splits across v7x's two
    # TensorCores), L is the "arbitrary" accumulation axis.
    sums, sqs = pl.pallas_call(
        _stats_kernel,
        out_shape=(jax.ShapeDtypeStruct((B, 8, E_pad), jnp.float32),
                   jax.ShapeDtypeStruct((B, 8, E_pad), jnp.float32)),
        grid=(B, n_l),
        in_specs=[
            pl.BlockSpec((None, tn, K), lambda b, i: (b, i, 0)),
            pl.BlockSpec((K, E_pad), lambda b, i: (0, 0)),
        ],
        out_specs=(pl.BlockSpec((None, 8, E_pad), lambda b, i: (b, 0, 0)),
                   pl.BlockSpec((None, 8, E_pad), lambda b, i: (b, 0, 0))),
        compiler_params=pltpu.CompilerParams(
            dimension_semantics=("parallel", "arbitrary"),
            vmem_limit_bytes=vmem_budget),
    )(patches, w_ke)

    # Fold BN into per-channel scale/shift (tiny [E_pad] math, done once).
    # NOTE: E[y^2]-E[y]^2 in f32 can lose precision for very large N / |mean|>>std;
    # per-batch partials reduce (but do not eliminate) the cancellation risk.
    n_valid = B * L
    s = jnp.sum(sums, axis=(0, 1))                         # (E_pad,)
    sq = jnp.sum(sqs, axis=(0, 1))
    mean = s / n_valid
    var = jnp.maximum(sq / n_valid - mean * mean, 0.0)     # biased var (PyTorch BN)
    g = gamma.astype(jnp.float32)
    bt = beta.astype(jnp.float32)
    if E_pad != E:
        g = jnp.pad(g, (0, E_pad - E))
        bt = jnp.pad(bt, (0, E_pad - E))
    scale = g * lax.rsqrt(var + EPS)
    shift = bt - mean * scale
    scale = scale.reshape(E_pad, 1)                        # broadcast along lanes
    shift = shift.reshape(E_pad, 1)

    # ---- pass 2: recompute matmul per tile, normalize, channels-first store --
    out = pl.pallas_call(
        _normalize_kernel,
        out_shape=jax.ShapeDtypeStruct((B, E_pad, Lp), out_dtype),
        grid=(B, n_l),
        in_specs=[
            pl.BlockSpec((None, tn, K), lambda b, i: (b, i, 0)),
            pl.BlockSpec((E_pad, K), lambda b, i: (0, 0)),
            pl.BlockSpec((E_pad, 1), lambda b, i: (0, 0)),
            pl.BlockSpec((E_pad, 1), lambda b, i: (0, 0)),
        ],
        out_specs=pl.BlockSpec((None, E_pad, tn), lambda b, i: (b, 0, i)),
        compiler_params=pltpu.CompilerParams(
            dimension_semantics=("parallel", "parallel"),
            vmem_limit_bytes=vmem_budget),
    )(patches, w_ek, scale, shift)

    if E_pad != E or Lp != L:
        out = out[:, :E, :L]
    # Output is already channels-first; this reshape is free (no transpose).
    return out.reshape(B, E, Do, Ho, Wo)


if __name__ == "__main__":
    # Small shapes consistent with the module (in_chans=3, k=stride=3),
    # shrunken embed_dim for the demo.
    B, C, D, H, W = 2, 3, 6, 6, 6
    E, k = 32, 3

    key = jax.random.PRNGKey(0)
    kx, kw, kb = jax.random.split(key, 3)

    x = jax.random.normal(kx, (B, C, D, H, W), dtype=jnp.float32)

    fan_in = C * k * k * k
    bound = 1.0 / (fan_in ** 0.5)
    conv_w = jax.random.uniform(kw, (E, C, k, k, k), jnp.float32, -bound, bound)
    conv_b = jax.random.uniform(kb, (E,), jnp.float32, -bound, bound)
    gamma = jnp.ones((E,), jnp.float32)
    beta = jnp.zeros((E,), jnp.float32)

    y = embedding_forward(x, conv_w, conv_b, gamma, beta, patch_size=k, stride=k)
    y = jax.block_until_ready(y)
    assert y.shape == (B, E, D // k, H // k, W // k)

    # Plain-JAX f32 reference (conv-as-patch-matmul + training-mode BN, WITH the
    # conv bias -- it must cancel exactly under the batch-stat normalization).
    Do, Ho, Wo = D // k, H // k, W // k
    xp = x.reshape(B, C, Do, k, Ho, k, Wo, k).transpose(0, 2, 4, 6, 1, 3, 5, 7)
    p = xp.reshape(B * Do * Ho * Wo, C * k * k * k)
    yr = p @ conv_w.reshape(E, -1).T + conv_b
    mu = yr.mean(axis=0)
    var = ((yr - mu) ** 2).mean(axis=0)
    yr = (yr - mu) * lax.rsqrt(var + EPS) * gamma + beta
    yr = yr.reshape(B, Do, Ho, Wo, E).transpose(0, 4, 1, 2, 3)

    err = float(jnp.max(jnp.abs(y.astype(jnp.float32) - yr)))
    assert err < 0.1, f"max abs error vs reference: {err}"
    print("KERNEL_OK")
</pallas_src>

<mosaic_0001>
module attributes {stable_mosaic.version = 11 : i64} {
  func.func @_stats_kernel(%arg0: i32, %arg1: i32, %arg2: memref<1x16x81xbf16, #tpu.memory_space<vmem>>, %arg3: memref<81x128xbf16, #tpu.memory_space<vmem>>, %arg4: memref<1x8x128xf32, #tpu.memory_space<vmem>>, %arg5: memref<1x8x128xf32, #tpu.memory_space<vmem>>) attributes {dimension_semantics = [#tpu.dimension_semantics<parallel>, #tpu.dimension_semantics<arbitrary>], iteration_bounds = array<i64: 2, 1>, scalar_prefetch = 0 : i64, scratch_operands = 0 : i64, tpu.core_type = #tpu.core_type<tc>, window_params = [{transform_indices = @transform_0, window_bounds = array<i64: 1, 16, 81>}, {pipeline_mode = #tpu.pipeline_mode<synchronous>, transform_indices = @transform_1, window_bounds = array<i64: 81, 128>}, {transform_indices = @transform_2, window_bounds = array<i64: 1, 8, 128>}, {transform_indices = @transform_3, window_bounds = array<i64: 1, 8, 128>}]} {
    %c0_i32 = arith.constant 0 : i32
    %0 = arith.cmpi eq, %arg1, %c0_i32 : i32
    %1 = arith.extui %0 : i1 to i32
    %c0_i32_0 = arith.constant 0 : i32
    %2 = arith.cmpi ne, %1, %c0_i32_0 : i32
    scf.if %2 {
      %cst_19 = arith.constant 0.000000e+00 : f32
      %23 = vector.broadcast %cst_19 : f32 to vector<8x128xf32>
      %c0_20 = arith.constant 0 : index
      %c0_21 = arith.constant 0 : index
      %c0_22 = arith.constant 0 : index
      %24 = vector.load %arg4[%c0_20, %c0_21, %c0_22] : memref<1x8x128xf32, #tpu.memory_space<vmem>>, vector<1x8x128xf32>
      %25 = vector.shape_cast %24 : vector<1x8x128xf32> to vector<8x128xf32>
      %26 = vector.shape_cast %23 : vector<8x128xf32> to vector<1x8x128xf32>
      tpu.vector_store %arg4[%c0_20, %c0_21, %c0_22], %26 {strides = array<i32>} : memref<1x8x128xf32, #tpu.memory_space<vmem>>, vector<1x8x128xf32>,
      %cst_23 = arith.constant 0.000000e+00 : f32
      %27 = vector.broadcast %cst_23 : f32 to vector<8x128xf32>
      %c0_24 = arith.constant 0 : index
      %c0_25 = arith.constant 0 : index
      %c0_26 = arith.constant 0 : index
      %28 = vector.load %arg5[%c0_24, %c0_25, %c0_26] : memref<1x8x128xf32, #tpu.memory_space<vmem>>, vector<1x8x128xf32>
      %29 = vector.shape_cast %28 : vector<1x8x128xf32> to vector<8x128xf32>
      %30 = vector.shape_cast %27 : vector<8x128xf32> to vector<1x8x128xf32>
      tpu.vector_store %arg5[%c0_24, %c0_25, %c0_26], %30 {strides = array<i32>} : memref<1x8x128xf32, #tpu.memory_space<vmem>>, vector<1x8x128xf32>,
    } else {
    }
    %c0 = arith.constant 0 : index
    %c0_1 = arith.constant 0 : index
    %c0_2 = arith.constant 0 : index
    %3 = vector.load %arg2[%c0, %c0_1, %c0_2] : memref<1x16x81xbf16, #tpu.memory_space<vmem>>, vector<1x16x81xbf16>
    %4 = vector.shape_cast %3 : vector<1x16x81xbf16> to vector<16x81xbf16>
    %c0_3 = arith.constant 0 : index
    %c0_4 = arith.constant 0 : index
    %5 = vector.load %arg3[%c0_3, %c0_4] : memref<81x128xbf16, #tpu.memory_space<vmem>>, vector<81x128xbf16>
    %cst = arith.constant dense<0.000000e+00> : vector<16x128xf32>
    %6 = tpu.matmul %4, %5, %cst {dimension_numbers = #tpu.dot_dimension_numbers<[1], [0], [0], [1], [0, 0, 1, 1], [], []>} : vector<16x81xbf16>, vector<81x128xbf16>, vector<16x128xf32> -> vector<16x128xf32>
    %7 = vector.shape_cast %6 : vector<16x128xf32> to vector<2x8x128xf32>
    %c0_5 = arith.constant 0 : index
    %c0_6 = arith.constant 0 : index
    %c0_7 = arith.constant 0 : index
    %8 = vector.load %arg4[%c0_5, %c0_6, %c0_7] : memref<1x8x128xf32, #tpu.memory_space<vmem>>, vector<1x8x128xf32>
    %9 = vector.shape_cast %8 : vector<1x8x128xf32> to vector<8x128xf32>
    %cst_8 = arith.constant dense<0.000000e+00> : vector<8x128xf32>
    %10 = vector.multi_reduction <add>, %7, %cst_8 [0] : vector<2x8x128xf32> to vector<8x128xf32>
    %11 = arith.addf %9, %10 : vector<8x128xf32>
    %c0_9 = arith.constant 0 : index
    %c0_10 = arith.constant 0 : index
    %c0_11 = arith.constant 0 : index
    %12 = vector.load %arg4[%c0_9, %c0_10, %c0_11] : memref<1x8x128xf32, #tpu.memory_space<vmem>>, vector<1x8x128xf32>
    %13 = vector.shape_cast %12 : vector<1x8x128xf32> to vector<8x128xf32>
    %14 = vector.shape_cast %11 : vector<8x128xf32> to vector<1x8x128xf32>
    tpu.vector_store %arg4[%c0_9, %c0_10, %c0_11], %14 {strides = array<i32>} : memref<1x8x128xf32, #tpu.memory_space<vmem>>, vector<1x8x128xf32>,
    %c0_12 = arith.constant 0 : index
    %c0_13 = arith.constant 0 : index
    %c0_14 = arith.constant 0 : index
    %15 = vector.load %arg5[%c0_12, %c0_13, %c0_14] : memref<1x8x128xf32, #tpu.memory_space<vmem>>, vector<1x8x128xf32>
    %16 = vector.shape_cast %15 : vector<1x8x128xf32> to vector<8x128xf32>
    %17 = arith.mulf %7, %7 : vector<2x8x128xf32>
    %cst_15 = arith.constant dense<0.000000e+00> : vector<8x128xf32>
    %18 = vector.multi_reduction <add>, %17, %cst_15 [0] : vector<2x8x128xf32> to vector<8x128xf32>
    %19 = arith.addf %16, %18 : vector<8x128xf32>
    %c0_16 = arith.constant 0 : index
    %c0_17 = arith.constant 0 : index
    %c0_18 = arith.constant 0 : index
    %20 = vector.load %arg5[%c0_16, %c0_17, %c0_18] : memref<1x8x128xf32, #tpu.memory_space<vmem>>, vector<1x8x128xf32>
    %21 = vector.shape_cast %20 : vector<1x8x128xf32> to vector<8x128xf32>
    %22 = vector.shape_cast %19 : vector<8x128xf32> to vector<1x8x128xf32>
    tpu.vector_store %arg5[%c0_16, %c0_17, %c0_18], %22 {strides = array<i32>} : memref<1x8x128xf32, #tpu.memory_space<vmem>>, vector<1x8x128xf32>,
    return
  }
  func.func @transform_0(%arg0: i32, %arg1: i32) -> (i32, i32, i32) {
    %c0_i32 = arith.constant 0 : i32
    %c0_i32_0 = arith.constant 0 : i32
    return %arg0, %arg1, %c0_i32 : i32, i32, i32
  }
  func.func @transform_1(%arg0: i32, %arg1: i32) -> (i32, i32) {
    %c0_i32 = arith.constant 0 : i32
    %c0_i32_0 = arith.constant 0 : i32
    %c0_i32_1 = arith.constant 0 : i32
    return %c0_i32, %c0_i32_0 : i32, i32
  }
  func.func @transform_2(%arg0: i32, %arg1: i32) -> (i32, i32, i32) {
    %c0_i32 = arith.constant 0 : i32
    %c0_i32_0 = arith.constant 0 : i32
    %c0_i32_1 = arith.constant 0 : i32
    return %arg0, %c0_i32, %c0_i32_0 : i32, i32, i32
  }
  func.func @transform_3(%arg0: i32, %arg1: i32) -> (i32, i32, i32) {
    %c0_i32 = arith.constant 0 : i32
    %c0_i32_0 = arith.constant 0 : i32
    %c0_i32_1 = arith.constant 0 : i32
    return %arg0, %c0_i32, %c0_i32_0 : i32, i32, i32
  }
}

</mosaic_0001>

<bundles_post_ra>
// kernel: tpu_custom_call.1
= control target key start
LH: loop header
LB: loop body
LE: loop exit
PB: predicated region body
PF: predicated region fallthrough
CT: control target
= control target key end

     0   :  { %s1010_s0 = inlined_call_operand.hbm [shape: bf16[2,16,81], index: 0, kind: input, shape index: {}]   ;;  %s1011_s1 = inlined_call_operand.hbm [shape: bf16[81,128], index: 1, kind: input, shape index: {}]   ;;  %s1012_s2 = inlined_call_operand.hbm [shape: f32[2,8,128], index: 2, kind: output, shape index: {0}]   ;;  %s1013_s3 = inlined_call_operand.hbm [shape: f32[2,8,128], index: 3, kind: output, shape index: {1}]  }
   0x1   :  { %1015 = sst [smem:[#allocation14_spill]] %s1011_s1 }
   0x2   :  { %9 = vsyncpa [#allocation3], 0 }
   0x3   :  { %11 = vsyncpa [#allocation3 + $0x1], 0 }
   0x4   :  { %12 = vsyncpa [#allocation6], 0 }
   0x5   :  { %13 = vsyncpa [#allocation4], 0 }
   0x6   :  { %15 = vsyncpa [#allocation4 + $0x1], 0 }
   0x7   :  { %16 = vsyncpa [#allocation9], 0 }
   0x8   :  { %18 = vsyncpa [#allocation9 + $0x1], 0  ;;  %s824_s12 = smov 0   ;;  %s826_s13 = smov 0  }
   0x9   :  { %s828_s14 = smov 0   ;;  %s830_s15 = smov 0  }
   0xa   :  { %s832_s16 = smov 0   ;;  %s834_s17 = smov 0  }
   0xb LB: > { %s487_s18 = sadd.s32 4294967295, %s798_s17   ;;  %s488_s19 = sadd.s32 4294967294, %s798_s17   ;;  %s798_s17 = sphi %s834_s17, %s24_s17   ;;  %s794_s16 = sphi %s832_s16, %s1029_s16   ;;  %s790_s15 = sphi %s830_s15, %s1028_s15   ;;  %s786_s14 = sphi %s828_s14, %s1027_s14   ;;  %s782_s13 = sphi %s826_s13, %s1026_s13   ;;  %s778_s12 = sphi %s824_s12, %s1025_s12  }
   0xc   : > { %p58_p0 = scmp.ne.s32.totalorder %s782_s13, %s778_s12  ;;  %p858_p1 = scmp.eq.s32.totalorder %s487_s18, 0 }
   0xd   : > { %p862_p2 = scmp.eq.s32.totalorder %s487_s18, 1  ;;  %p109_p3 = scmp.eq.s32.totalorder %s488_s19, 1 }
   0xe   : > { %p868_p4 = por %p858_p1, %p58_p0  ;;  %p489_p5 = scmp.ge.s32.totalorder %s798_s17, 1 }
   0xf   : > { %p873_p6 = por %p109_p3, %p58_p0  ;;  %p142_p7 = scmp.lt.s32.totalorder %s798_s17, 3 }
  0x10   : > { %s1020_s1 = sld [smem:[#allocation14_spill]]  ;;  %s800_s28 = smov [#allocation5]  }
  0x11   : > { %p881_p8 = pnand %p489_p5, %p142_p7  ;;  %s155_s29 = sshll.u32 %s800_s28, 4  ;;  %s156_s29 = int_to_ptr.vmem [resolvable:$true] %s155_s29 }
  0x12   : > { %p491_p11 = scmp.ge.s32.totalorder %s798_s17, 2  ;;  %s1014_s30 = smov 64  }
  0x13   : > { %p548_p9 = pneg %p881_p8  ;;  %s802_s4 = smov 4  }
  0x14   : > { %s36_s5 = sadd.s32 1, %s794_s16  ;;  %s45_s6 = sadd.s32 1, %s786_s14 }
  0x15   : > { %p549_p10 = pnand %p548_p9, %p858_p1  ;;  %p38_p12 = scmp.ge.s32.totalorder %s36_s5, 2 }
  0x16   : > { %s153_s26 = sshll.u32 %s1020_s1, 4  ;;  %p52_p13 = scmp.ne.s32.totalorder %s786_s14, %s782_s13  ;;  %s154_s26 = int_to_ptr.hbm [resolvable:$true] %s153_s26 }
  0x17   : > { %551 = dma.hbm_to_vmem [thread:$0]  (!%p549_p10), %s154_s26, 704, %s156_s29, [#allocation6], %s1014_s30, %s1014_s30, %s802_s4  }
  0x18   : > { %p53_p0 = scmp.eq.s32.totalorder %s798_s17, 0  ;;  %s1031_s5 = smov (%p38_p12, %s36_s5), 0 }
  0x19   : > { %p906_p5 = por %p862_p2, %p52_p13  ;;  %s40_s9 = ssub.s32 %s794_s16, %s1031_s5 }
  0x1a   : > { %p900_p3 = por %p53_p0, %p52_p13  ;;  %p564_p7 = scmp.lt.s32.totalorder %s798_s17, 2 }
  0x1b   : > { %p43_p9 = scmp.eq.s32.totalorder %s40_s9, 0  ;;  %s169_s10 = sand.u32 1, %s786_s14  }
  0x1c   : > { %s492_s11 = sshll.u32 %s169_s10, 3  ;;  %s531_s19 = sshll.u32 %s794_s16, 3 }
  0x1d   : > { %s915_s18 = scalar_select %p43_p9, %s786_s14, %s45_s6  }
  0x1e   : > { %s180_s26 = scalar_lea.hbm %s1010_s0, %s531_s19  ;;  %s173_s28 = scalar_lea.vmem [#allocation2], %s492_s11 }
  0x1f   : > { %s183_s29 = sshll.u32 %s173_s28, 4  ;;  %s181_s21 = sshll.u32 %s180_s26, 4  ;;  %s184_s29 = int_to_ptr.vmem [resolvable:$true] %s183_s29  ;;  %s182_s21 = int_to_ptr.hbm [resolvable:$true] %s181_s21 }
  0x20   : > { %p553_p2 = pnand %p564_p7, %p900_p3  ;;  %s170_s30 = scalar_lea.sflag [#allocation3], %s169_s10 }
  0x21   : > { %s1024_s1 = smov 64   ;;  %195 = sbr.rel (%p881_p8) target bundleno = 222 (0xde), region = 28 }
  0x22   : > { %555 = dma.hbm_to_vmem [thread:$0]  (!%p553_p2), %s182_s21, 128, %s184_s29, %s170_s30, %s1024_s1, %s1024_s1, %s802_s4  }
  0x23   : > { %s929_s6 = sand.u32 (!%p881_p8), 1, %s782_s13  }
  0x24   : > { %s932_s9 = sshll.u32 (!%p881_p8), %s929_s6, 3  ;;  %s198_s11 = scalar_lea.sflag (!%p881_p8), [#allocation3], %s929_s6 }
  0x25   : > { %s201_s7 = scalar_lea.vmem (!%p881_p8), [#allocation2], %s932_s9 }
  0x26   : > { %761 = dma.done.wait (%p868_p4), %s198_s11, 128  }
  0x27   : > { %763 = vsyncadd (%p868_p4), %s198_s11, 4294967168 }
  0x28   : > { %765 = dma.done.wait (%p858_p1), [#allocation6], 704  }
  0x29   : > { %767 = vsyncadd (%p858_p1), [#allocation6], 4294966592  ;;  %vm298_vm0 = vcmask 1040384   ;;  %v255_v0 = vld [vmem:[#allocation5 + $0x28] sm:$0x1]  ;;  %v803_v2 = vmov 0  }
  0x2a   : > { %v282_v1 = vunpack.c.l.b16 %v255_v0  ;;  %v300_v3 = vsel %vm298_vm0, 65535, %v803_v2  ;;  %v537_v6 = vld [vmem:[#allocation5 + $0x20] sm:$0xff]  ;;  %v536_v7 = vld [vmem:[#allocation5 + $0x18] sm:$0xff]  ;;  %v535_v8 = vld [vmem:[#allocation5 + $0x10] sm:$0xff]  ;;  %vm294_vm1 = vcmask 662528   ;;  %s527_s1 = sshll.u32 %s790_s15, 3 }
  0x2b   : > { %v534_v9 = vld [vmem:[#allocation5 + $0x8] sm:$0xff]  ;;  %v533_v10 = vld [vmem:[#allocation5] sm:$0xff]  ;;  %v532_v11 = vld [vmem:[%s201_s7] sm:$0xff]  ;;  %s344_s27 = scalar_lea.hbm %s1012_s2, %s527_s1  ;;  %s358_s10 = scalar_lea.hbm %s1013_s3, %s527_s1 }
  0x2c   : > { %v288_v4 = vpack.c.b16 %v282_v1, %v282_v1  ;;  %s227_s19 = scalar_lea.vmem [#allocation7], %s932_s9  ;;  %s348_s25 = sshll.u32 %s344_s27, 4  ;;  %s349_s25 = int_to_ptr.hbm [resolvable:$true] %s348_s25 }
  0x2d   : > { %s952_s24 = sshll.u32 %s227_s19, 4  ;;  %s234_s15 = scalar_lea.vmem [#allocation8], %s932_s9  ;;  %s347_s24 = int_to_ptr.vmem [resolvable:$true] %s952_s24 }
  0x2e   : > { %v302_v5 = vand.u32 %v300_v3, %v288_v4  ;;  %s955_s26 = sshll.u32 %s234_s15, 4  ;;  %s362_s28 = sshll.u32 %s358_s10, 4  ;;  %s361_s26 = int_to_ptr.vmem [resolvable:$true] %s955_s26  ;;  %s959_s28 = int_to_ptr.hbm [resolvable:$true] %s362_s28 }
  0x2f   : > { %s329_s29 = scalar_lea.sflag [#allocation4], %s929_s6  ;;  %s694_s21 = sshra.s32 %s349_s25, 4  ;;  %s695_s21 = int_to_ptr.hbm [resolvable:$true] %s694_s21 }
  0x30   : > { %306 = vmatpush.bf16.msra.mxu0 %v302_v5  ;;  %s696_s11 = scalar_lea.hbm %s695_s21, 8  ;;  %s700_s1 = scalar_lea.hbm %s1012_s2, 16 }
  0x31   : > { %p697_p1 = scmp.ne.s32.totalorder %s695_s21, %s696_s11  ;;  %p701_p10 = scmp.lt.s32.totalorder %s695_s21, %s1012_s2 }
  0x32   : > { %p702_p12 = scmp.lt.s32.totalorder %s700_s1, %s696_s11 }
  0x33   : > { %p698_p4 = pnand %p697_p1, %p906_p5 }
  0x34   : > { %307 = vmatpush.bf16.msra.mxu0 %v537_v6  ;;  %p703_p13 = por %p702_p12, %p701_p10 }
  0x35   : > { %p699_p8 = pneg %p698_p4 }
  0x37   : > { %p704_p0 = pnand %p703_p13, %p699_p8 }
  0x38   : > { %308 = vmatpush.bf16.msra.mxu0 %v536_v7 }
  0x3c   : > { %309 = vmatpush.bf16.msra.mxu0 %v535_v8 }
  0x40   : > { %310 = vmatpush.bf16.msra.mxu0 %v534_v9 }
  0x44   : > { %311 = vmatpush.bf16.msra.mxu0 %v533_v10 }
  0x47   : > { %524 = vmatmul.msk.bf16.vlgmr.msra.gmra.mxu0 %vm294_vm1, %v532_v11 }
  0xc4   : > { %v313_v12 = vpop.f32.mrf.mxu0 }
  0xc5   : > { %v323_v14 = vmul.f32 %v313_v12, %v313_v12 }
  0xcc   : > { %v315_v13 = vpop.f32.mrf.mxu0 }
  0xcd   : > { %v319_v15 = vadd.f32 %v315_v13, %v313_v12  ;;  %v324_v16 = vmul.f32 %v315_v13, %v315_v13 }
  0xcf   : > { %v325_v17 = vadd.f32 %v324_v16, %v323_v14  ;;  %321 = vst [vmem:[%s227_s19] sm:$0xff] %v319_v15 }
  0xd0   : > { %707 = shalt.err (!%p704_p0)
}
  0xd1   : > { %544 = dma.vmem_to_hbm [thread:$0]  (%p906_p5), %s347_s24, 128, %s349_s25, %s329_s29   ;;  %327 = vst [vmem:[%s234_s15] sm:$0xff] %v325_v17 }
  0xd2   : > { %s334_s27 = scalar_lea.sflag [#allocation9], %s929_s6  ;;  %s722_s30 = sshra.s32 %s959_s28, 4  ;;  %s723_s30 = int_to_ptr.hbm [resolvable:$true] %s722_s30 }
  0xd3   : > { %s724_s4 = scalar_lea.hbm %s723_s30, 8  ;;  %s728_s21 = scalar_lea.hbm %s1013_s3, 16 }
  0xd4   : > { %p725_p3 = scmp.ne.s32.totalorder %s723_s30, %s724_s4  ;;  %p729_p2 = scmp.lt.s32.totalorder %s723_s30, %s1013_s3 }
  0xd5   : > { %p730_p1 = scmp.lt.s32.totalorder %s728_s21, %s724_s4 }
  0xd6   : > { %p726_p7 = pnand %p725_p3, %p906_p5 }
  0xd7   : > { %p731_p4 = por %p730_p1, %p729_p2 }
  0xd8   : > { %p727_p9 = pneg %p726_p7 }
  0xda   : > { %p732_p8 = pnand %p731_p4, %p727_p9 }
  0xdc   : > { %735 = shalt.err (!%p732_p8)
}
  0xdd   : > { %545 = dma.vmem_to_hbm [thread:$0]  (%p906_p5), %s361_s26, 128, %s959_s28, %s334_s27  }
  0xde PF: > { %s374_s6 = sand.u32 1, %s778_s12   ;;  %p557_p10 = pnand %p491_p11, %p873_p6 }
  0xdf   : > { %s375_s24 = scalar_lea.sflag [#allocation4], %s374_s6 }
  0xe0   : > { %p558_p12 = pneg %p557_p10 }
  0xe2   : > { %769 = dma.done.wait (%p558_p12), %s375_s24, 128  }
  0xe3   : > { %771 = vsyncadd (%p558_p12), %s375_s24, 4294967168  ;;  %s385_s25 = scalar_lea.sflag [#allocation9], %s374_s6 }
  0xe4   : > { %773 = dma.done.wait (%p558_p12), %s385_s25, 128  }
  0xe5   : > { %775 = vsyncadd (%p558_p12), %s385_s25, 4294967168  ;;  %s24_s17 = sadd.s32 1, %s798_s17   ;;  %s1025_s12 = smov %s782_s13 }
  0xe6   : > { %p21_p13 = scmp.ge.s32.totalorder %s24_s17, 4   ;;  %s1026_s13 = smov %s786_s14 }
  0xe7   : > { %s1027_s14 = smov %s915_s18  ;;  %s1028_s15 = smov %s794_s16 }
  0xe8   : > { %s1029_s16 = smov %s1031_s5  ;;  %23 = sbr.rel (!%p21_p13) target bundleno = 11 (0xb), region = 98 }
  0xed   :  { %391 = vsyncpa [#allocation3], 1 }
  0xee   :  { %393 = vsyncpa [#allocation3 + $0x1], 1 }
  0xef   :  { %394 = vsyncpa [#allocation6], 1 }
  0xf0   :  { %395 = vsyncpa [#allocation4], 1 }
  0xf1   :  { %397 = vsyncpa [#allocation4 + $0x1], 1 }
  0xf2   :  { %398 = vsyncpa [#allocation9], 1 }
  0xf3   :  { %400 = vsyncpa [#allocation9 + $0x1], 1 }

</bundles_post_ra>
